<compile_context>
chip_gen: v7x
topology: tpu7x:2x2x1
jax: 0.10.0
libtpu: 0.0.40
codegen_flags: <defaults>
</compile_context>

<pallas_src>
import functools

import jax
import jax.numpy as jnp
import numpy as np
from jax.experimental import pallas as pl
from jax.experimental.pallas import tpu as pltpu


# ---------------------------------------------------------------------------
# Phase 1: encoder -> fused [mu | logvar] slab
# ---------------------------------------------------------------------------
def _encoder_kernel(x_ref, w1_ref, b1_ref, w2_ref, b2_ref, wmv_ref, bmv_ref,
                    mulv_ref):
    x = x_ref[...]  # bf16 (TB, D)
    h = jnp.dot(x, w1_ref[...], preferred_element_type=jnp.float32) + b1_ref[...]
    h = jnp.maximum(h, 0.0)
    h = jnp.dot(h.astype(jnp.bfloat16), w2_ref[...],
                preferred_element_type=jnp.float32) + b2_ref[...]
    h = jnp.maximum(h, 0.0)
    # fused fc_mu / fc_logvar: one matmul, one lane-dense store.
    mulv_ref[...] = (jnp.dot(h.astype(jnp.bfloat16), wmv_ref[...],
                             preferred_element_type=jnp.float32) + bmv_ref[...])


# ---------------------------------------------------------------------------
# Phase 2: scale + reparameterize + decoder + qnet -> one lane-dense slab
# ---------------------------------------------------------------------------
def _decoder_kernel(mu_ref, logvar_ref, eps_ref, stdmu_ref,
                    wd1_ref, bd1_ref, wd2_ref, bd2_ref,
                    wq1_ref, bq1_ref, wq2_ref, bq2_ref,
                    out_ref, *, des_std, batch_size):
    mu = mu_ref[...]
    logvar = logvar_ref[...]

    if batch_size == 1:
        scaled_mu = mu  # torch: f_vec = ones_like(mu) for batch of 1
    else:
        # curr_epoch (0) <= f_epo (1.0) => dimension-wise scaling.
        # Divide routed to the EUP via pl.reciprocal.
        f_vec = des_std * pl.reciprocal(stdmu_ref[...] + 1e-8, approx=False)
        scaled_mu = f_vec * mu

    std = jnp.exp(0.5 * logvar)
    z = scaled_mu + eps_ref[...] * std

    # decoder: Linear -> ReLU -> Linear -> Sigmoid
    d = jnp.dot(z.astype(jnp.bfloat16), wd1_ref[...],
                preferred_element_type=jnp.float32) + bd1_ref[...]
    d = jnp.maximum(d, 0.0)
    x_hat = jax.nn.sigmoid(
        jnp.dot(d.astype(jnp.bfloat16), wd2_ref[...],
                preferred_element_type=jnp.float32) + bd2_ref[...])

    # QNet: Linear -> ReLU -> Linear
    q = jnp.dot(x_hat.astype(jnp.bfloat16), wq1_ref[...],
                preferred_element_type=jnp.float32) + bq1_ref[...]
    q = jnp.maximum(q, 0.0)
    q_dist = jnp.dot(q.astype(jnp.bfloat16), wq2_ref[...],
                     preferred_element_type=jnp.float32) + bq2_ref[...]

    # Single lane-dense store: [x_hat | scaled_mu | z | q_dist]
    out_ref[...] = jnp.concatenate([x_hat, scaled_mu, z, q_dist], axis=-1)


# ---------------------------------------------------------------------------
# Wrapper
# ---------------------------------------------------------------------------
def _pick_batch_tile(batch):
    for tb in (1024, 512, 256, 128, 64, 32, 16, 8):
        if batch % tb == 0:
            return tb
    return batch


@functools.partial(jax.jit, static_argnames=("des_std",))
def scale_vae_forward(x, eps, params, des_std=1.0):
    B, D = x.shape
    L = params["wmu"].shape[1]
    H = params["w1"].shape[1]
    TB = _pick_batch_tile(B)
    grid = (B // TB,)
    bf16 = jnp.bfloat16

    def row_spec(shape):
        return pl.BlockSpec(shape, lambda i: (i, 0))

    def const_spec(shape):  # weights/biases: resident across all batch tiles
        return pl.BlockSpec(shape, lambda i: (0, 0))

    cparams = pltpu.CompilerParams(dimension_semantics=("parallel",))

    # Fuse fc_mu / fc_logvar weights -> one (H, 2L) matmul.
    wmv = jnp.concatenate([params["wmu"], params["wlv"]], axis=1).astype(bf16)
    bmv = jnp.concatenate([params["bmu"], params["blv"]], axis=1)

    # -------- phase 1: encoder -> [mu | logvar] --------
    mulv = pl.pallas_call(
        _encoder_kernel,
        out_shape=jax.ShapeDtypeStruct((B, 2 * L), jnp.float32),
        grid=grid,
        in_specs=[
            row_spec((TB, D)),
            const_spec((D, H)), const_spec((1, H)),
            const_spec((H, H)), const_spec((1, H)),
            const_spec((H, 2 * L)), const_spec((1, 2 * L)),
        ],
        out_specs=row_spec((TB, 2 * L)),
        compiler_params=cparams,
    )(x.astype(bf16),
      params["w1"].astype(bf16), params["b1"],
      params["w2"].astype(bf16), params["b2"],
      wmv, bmv)

    mu = mulv[:, :L]
    logvar = mulv[:, L:]

    # -------- batch statistic (couples all rows) -> tiny XLA op --------
    if B == 1:
        std_mu = jnp.ones((1, L), jnp.float32)  # unused; f_vec==1 path in kernel
    else:
        std_mu = jnp.std(mu, axis=0, keepdims=True)  # population std (ddof=0)

    # -------- phase 2: scale + reparam + decoder + qnet --------
    slab_w = D + 4 * L
    kernel2 = functools.partial(_decoder_kernel, des_std=des_std, batch_size=B)
    slab = pl.pallas_call(
        kernel2,
        out_shape=jax.ShapeDtypeStruct((B, slab_w), jnp.float32),
        grid=grid,
        in_specs=[
            row_spec((TB, L)),           # mu
            row_spec((TB, L)),           # logvar
            row_spec((TB, L)),           # eps
            const_spec((1, L)),          # std_mu (full-batch statistic)
            const_spec((L, H)), const_spec((1, H)),    # decoder L1
            const_spec((H, D)), const_spec((1, D)),    # decoder L2
            const_spec((D, H)), const_spec((1, H)),    # qnet L1
            const_spec((H, 2 * L)), const_spec((1, 2 * L)),  # qnet L2
        ],
        out_specs=row_spec((TB, slab_w)),
        compiler_params=cparams,
    )(mu, logvar, eps, std_mu,
      params["wd1"].astype(bf16), params["bd1"],
      params["wd2"].astype(bf16), params["bd2"],
      params["wq1"].astype(bf16), params["bq1"],
      params["wq2"].astype(bf16), params["bq2"])

    x_hat = slab[:, :D]
    scaled_mu = slab[:, D:D + L]
    z = slab[:, D + L:D + 2 * L]
    q_dist = slab[:, D + 2 * L:]
    return x_hat, scaled_mu, logvar, mu, z, q_dist


# ---------------------------------------------------------------------------
# Params (PyTorch-style init) + pure-JAX reference (same bf16 MXU precision)
# ---------------------------------------------------------------------------
def init_linear(key, fan_in, fan_out):
    """PyTorch uniform(-1/sqrt(fan_in), 1/sqrt(fan_in)); W stored (in, out)."""
    kw, kb = jax.random.split(key)
    bound = 1.0 / np.sqrt(fan_in)
    w = jax.random.uniform(kw, (fan_in, fan_out), jnp.float32, -bound, bound)
    b = jax.random.uniform(kb, (1, fan_out), jnp.float32, -bound, bound)
    return w, b


def make_params(key, input_dim, latent_dim, hidden_dim):
    keys = jax.random.split(key, 8)
    p = {}
    p["w1"], p["b1"] = init_linear(keys[0], input_dim, hidden_dim)       # encoder L1
    p["w2"], p["b2"] = init_linear(keys[1], hidden_dim, hidden_dim)      # encoder L2
    p["wmu"], p["bmu"] = init_linear(keys[2], hidden_dim, latent_dim)    # fc_mu
    p["wlv"], p["blv"] = init_linear(keys[3], hidden_dim, latent_dim)    # fc_logvar
    p["wd1"], p["bd1"] = init_linear(keys[4], latent_dim, hidden_dim)    # decoder L1
    p["wd2"], p["bd2"] = init_linear(keys[5], hidden_dim, input_dim)     # decoder L2
    p["wq1"], p["bq1"] = init_linear(keys[6], input_dim, hidden_dim)     # qnet L1
    p["wq2"], p["bq2"] = init_linear(keys[7], hidden_dim, 2 * latent_dim)  # qnet L2
    return p


def scale_vae_reference(x, eps, params, *, des_std=1.0):
    """Pure-JAX reference using the same bf16-input / f32-accumulate matmuls."""
    bf16 = jnp.bfloat16

    def lin(a, w, b):
        return jnp.dot(a.astype(bf16), w.astype(bf16),
                       preferred_element_type=jnp.float32) + b

    h = jnp.maximum(lin(x, params["w1"], params["b1"]), 0.0)
    h = jnp.maximum(lin(h, params["w2"], params["b2"]), 0.0)
    mu = lin(h, params["wmu"], params["bmu"])
    logvar = lin(h, params["wlv"], params["blv"])
    if x.shape[0] == 1:
        scaled_mu = mu
    else:
        std_mu = jnp.std(mu, axis=0, keepdims=True)
        scaled_mu = (des_std / (std_mu + 1e-8)) * mu
    z = scaled_mu + eps * jnp.exp(0.5 * logvar)
    d = jnp.maximum(lin(z, params["wd1"], params["bd1"]), 0.0)
    x_hat = jax.nn.sigmoid(lin(d, params["wd2"], params["bd2"]))
    q = jnp.maximum(lin(x_hat, params["wq1"], params["bq1"]), 0.0)
    q_dist = lin(q, params["wq2"], params["bq2"])
    return x_hat, scaled_mu, logvar, mu, z, q_dist


if __name__ == "__main__":
    B, INPUT_DIM, LATENT_DIM, HIDDEN_DIM = 8, 64, 16, 32

    key = jax.random.PRNGKey(0)
    kx, keps, kparams = jax.random.split(key, 3)

    x = jax.random.uniform(kx, (B, INPUT_DIM), jnp.float32)        # flattened input
    eps = jax.random.normal(keps, (B, LATENT_DIM), jnp.float32)    # torch.randn_like(std)
    params = make_params(kparams, INPUT_DIM, LATENT_DIM, HIDDEN_DIM)

    outs = scale_vae_forward(x, eps, params, des_std=1.0)
    outs = jax.block_until_ready(outs)

    refs = scale_vae_reference(x, eps, params, des_std=1.0)
    names = ["x_hat", "scaled_mu", "logvar", "mu", "z", "q_dist"]
    for name, got, ref in zip(names, outs, refs):
        np.testing.assert_allclose(np.asarray(got), np.asarray(ref),
                                   rtol=5e-3, atol=5e-3, err_msg=name)

    print("KERNEL_OK")
</pallas_src>

<mosaic_0001>
module attributes {stable_mosaic.version = 11 : i64} {
  func.func @_encoder_kernel(%arg0: i32, %arg1: memref<8x64xbf16, #tpu.memory_space<vmem>>, %arg2: memref<64x32xbf16, #tpu.memory_space<vmem>>, %arg3: memref<1x32xf32, #tpu.memory_space<vmem>>, %arg4: memref<32x32xbf16, #tpu.memory_space<vmem>>, %arg5: memref<1x32xf32, #tpu.memory_space<vmem>>, %arg6: memref<32x32xbf16, #tpu.memory_space<vmem>>, %arg7: memref<1x32xf32, #tpu.memory_space<vmem>>, %arg8: memref<8x32xf32, #tpu.memory_space<vmem>>) attributes {dimension_semantics = [#tpu.dimension_semantics<parallel>], iteration_bounds = array<i64: 1>, scalar_prefetch = 0 : i64, scratch_operands = 0 : i64, tpu.core_type = #tpu.core_type<tc>, window_params = [{transform_indices = @transform_0, window_bounds = array<i64: 8, 64>}, {pipeline_mode = #tpu.pipeline_mode<synchronous>, transform_indices = @transform_1, window_bounds = array<i64: 64, 32>}, {pipeline_mode = #tpu.pipeline_mode<synchronous>, transform_indices = @transform_2, window_bounds = array<i64: 1, 32>}, {pipeline_mode = #tpu.pipeline_mode<synchronous>, transform_indices = @transform_3, window_bounds = array<i64: 32, 32>}, {pipeline_mode = #tpu.pipeline_mode<synchronous>, transform_indices = @transform_4, window_bounds = array<i64: 1, 32>}, {pipeline_mode = #tpu.pipeline_mode<synchronous>, transform_indices = @transform_5, window_bounds = array<i64: 32, 32>}, {pipeline_mode = #tpu.pipeline_mode<synchronous>, transform_indices = @transform_6, window_bounds = array<i64: 1, 32>}, {transform_indices = @transform_7, window_bounds = array<i64: 8, 32>}]} {
    %c0 = arith.constant 0 : index
    %c0_0 = arith.constant 0 : index
    %0 = vector.load %arg1[%c0, %c0_0] : memref<8x64xbf16, #tpu.memory_space<vmem>>, vector<8x64xbf16>
    %c0_1 = arith.constant 0 : index
    %c0_2 = arith.constant 0 : index
    %1 = vector.load %arg2[%c0_1, %c0_2] : memref<64x32xbf16, #tpu.memory_space<vmem>>, vector<64x32xbf16>
    %cst = arith.constant dense<0.000000e+00> : vector<8x32xf32>
    %2 = tpu.matmul %0, %1, %cst {dimension_numbers = #tpu.dot_dimension_numbers<[1], [0], [0], [1], [0, 0, 1, 1], [], []>} : vector<8x64xbf16>, vector<64x32xbf16>, vector<8x32xf32> -> vector<8x32xf32>
    %c0_3 = arith.constant 0 : index
    %c0_4 = arith.constant 0 : index
    %3 = vector.load %arg3[%c0_3, %c0_4] : memref<1x32xf32, #tpu.memory_space<vmem>>, vector<1x32xf32>
    %4 = vector.broadcast %3 : vector<1x32xf32> to vector<8x32xf32>
    %5 = arith.addf %2, %4 : vector<8x32xf32>
    %cst_5 = arith.constant 0.000000e+00 : f32
    %6 = vector.broadcast %cst_5 : f32 to vector<8x32xf32>
    %7 = arith.maximumf %5, %6 : vector<8x32xf32>
    %8 = arith.truncf %7 : vector<8x32xf32> to vector<8x32xbf16>
    %c0_6 = arith.constant 0 : index
    %c0_7 = arith.constant 0 : index
    %9 = vector.load %arg4[%c0_6, %c0_7] : memref<32x32xbf16, #tpu.memory_space<vmem>>, vector<32x32xbf16>
    %cst_8 = arith.constant dense<0.000000e+00> : vector<8x32xf32>
    %10 = tpu.matmul %8, %9, %cst_8 {dimension_numbers = #tpu.dot_dimension_numbers<[1], [0], [0], [1], [0, 0, 1, 1], [], []>} : vector<8x32xbf16>, vector<32x32xbf16>, vector<8x32xf32> -> vector<8x32xf32>
    %c0_9 = arith.constant 0 : index
    %c0_10 = arith.constant 0 : index
    %11 = vector.load %arg5[%c0_9, %c0_10] : memref<1x32xf32, #tpu.memory_space<vmem>>, vector<1x32xf32>
    %12 = vector.broadcast %11 : vector<1x32xf32> to vector<8x32xf32>
    %13 = arith.addf %10, %12 : vector<8x32xf32>
    %cst_11 = arith.constant 0.000000e+00 : f32
    %14 = vector.broadcast %cst_11 : f32 to vector<8x32xf32>
    %15 = arith.maximumf %13, %14 : vector<8x32xf32>
    %16 = arith.truncf %15 : vector<8x32xf32> to vector<8x32xbf16>
    %c0_12 = arith.constant 0 : index
    %c0_13 = arith.constant 0 : index
    %17 = vector.load %arg6[%c0_12, %c0_13] : memref<32x32xbf16, #tpu.memory_space<vmem>>, vector<32x32xbf16>
    %cst_14 = arith.constant dense<0.000000e+00> : vector<8x32xf32>
    %18 = tpu.matmul %16, %17, %cst_14 {dimension_numbers = #tpu.dot_dimension_numbers<[1], [0], [0], [1], [0, 0, 1, 1], [], []>} : vector<8x32xbf16>, vector<32x32xbf16>, vector<8x32xf32> -> vector<8x32xf32>
    %c0_15 = arith.constant 0 : index
    %c0_16 = arith.constant 0 : index
    %19 = vector.load %arg7[%c0_15, %c0_16] : memref<1x32xf32, #tpu.memory_space<vmem>>, vector<1x32xf32>
    %20 = vector.broadcast %19 : vector<1x32xf32> to vector<8x32xf32>
    %21 = arith.addf %18, %20 : vector<8x32xf32>
    %c0_17 = arith.constant 0 : index
    %c0_18 = arith.constant 0 : index
    %22 = vector.load %arg8[%c0_17, %c0_18] : memref<8x32xf32, #tpu.memory_space<vmem>>, vector<8x32xf32>
    tpu.vector_store %arg8[%c0_17, %c0_18], %21 {strides = array<i32>} : memref<8x32xf32, #tpu.memory_space<vmem>>, vector<8x32xf32>,
    return
  }
  func.func @transform_0(%arg0: i32) -> (i32, i32) {
    %c0_i32 = arith.constant 0 : i32
    %c0_i32_0 = arith.constant 0 : i32
    return %arg0, %c0_i32 : i32, i32
  }
  func.func @transform_1(%arg0: i32) -> (i32, i32) {
    %c0_i32 = arith.constant 0 : i32
    %c0_i32_0 = arith.constant 0 : i32
    %c0_i32_1 = arith.constant 0 : i32
    return %c0_i32, %c0_i32_0 : i32, i32
  }
  func.func @transform_2(%arg0: i32) -> (i32, i32) {
    %c0_i32 = arith.constant 0 : i32
    %c0_i32_0 = arith.constant 0 : i32
    %c0_i32_1 = arith.constant 0 : i32
    return %c0_i32, %c0_i32_0 : i32, i32
  }
  func.func @transform_3(%arg0: i32) -> (i32, i32) {
    %c0_i32 = arith.constant 0 : i32
    %c0_i32_0 = arith.constant 0 : i32
    %c0_i32_1 = arith.constant 0 : i32
    return %c0_i32, %c0_i32_0 : i32, i32
  }
  func.func @transform_4(%arg0: i32) -> (i32, i32) {
    %c0_i32 = arith.constant 0 : i32
    %c0_i32_0 = arith.constant 0 : i32
    %c0_i32_1 = arith.constant 0 : i32
    return %c0_i32, %c0_i32_0 : i32, i32
  }
  func.func @transform_5(%arg0: i32) -> (i32, i32) {
    %c0_i32 = arith.constant 0 : i32
    %c0_i32_0 = arith.constant 0 : i32
    %c0_i32_1 = arith.constant 0 : i32
    return %c0_i32, %c0_i32_0 : i32, i32
  }
  func.func @transform_6(%arg0: i32) -> (i32, i32) {
    %c0_i32 = arith.constant 0 : i32
    %c0_i32_0 = arith.constant 0 : i32
    %c0_i32_1 = arith.constant 0 : i32
    return %c0_i32, %c0_i32_0 : i32, i32
  }
  func.func @transform_7(%arg0: i32) -> (i32, i32) {
    %c0_i32 = arith.constant 0 : i32
    %c0_i32_0 = arith.constant 0 : i32
    return %arg0, %c0_i32 : i32, i32
  }
}

module attributes {stable_mosaic.version = 11 : i64} {
  func.func @_decoder_kernel(%arg0: i32, %arg1: memref<8x16xf32, #tpu.memory_space<vmem>>, %arg2: memref<8x16xf32, #tpu.memory_space<vmem>>, %arg3: memref<8x16xf32, #tpu.memory_space<vmem>>, %arg4: memref<1x16xf32, #tpu.memory_space<vmem>>, %arg5: memref<16x32xbf16, #tpu.memory_space<vmem>>, %arg6: memref<1x32xf32, #tpu.memory_space<vmem>>, %arg7: memref<32x64xbf16, #tpu.memory_space<vmem>>, %arg8: memref<1x64xf32, #tpu.memory_space<vmem>>, %arg9: memref<64x32xbf16, #tpu.memory_space<vmem>>, %arg10: memref<1x32xf32, #tpu.memory_space<vmem>>, %arg11: memref<32x32xbf16, #tpu.memory_space<vmem>>, %arg12: memref<1x32xf32, #tpu.memory_space<vmem>>, %arg13: memref<8x128xf32, #tpu.memory_space<vmem>>) attributes {dimension_semantics = [#tpu.dimension_semantics<parallel>], iteration_bounds = array<i64: 1>, scalar_prefetch = 0 : i64, scratch_operands = 0 : i64, tpu.core_type = #tpu.core_type<tc>, window_params = [{transform_indices = @transform_0, window_bounds = array<i64: 8, 16>}, {transform_indices = @transform_1, window_bounds = array<i64: 8, 16>}, {transform_indices = @transform_2, window_bounds = array<i64: 8, 16>}, {pipeline_mode = #tpu.pipeline_mode<synchronous>, transform_indices = @transform_3, window_bounds = array<i64: 1, 16>}, {pipeline_mode = #tpu.pipeline_mode<synchronous>, transform_indices = @transform_4, window_bounds = array<i64: 16, 32>}, {pipeline_mode = #tpu.pipeline_mode<synchronous>, transform_indices = @transform_5, window_bounds = array<i64: 1, 32>}, {pipeline_mode = #tpu.pipeline_mode<synchronous>, transform_indices = @transform_6, window_bounds = array<i64: 32, 64>}, {pipeline_mode = #tpu.pipeline_mode<synchronous>, transform_indices = @transform_7, window_bounds = array<i64: 1, 64>}, {pipeline_mode = #tpu.pipeline_mode<synchronous>, transform_indices = @transform_8, window_bounds = array<i64: 64, 32>}, {pipeline_mode = #tpu.pipeline_mode<synchronous>, transform_indices = @transform_9, window_bounds = array<i64: 1, 32>}, {pipeline_mode = #tpu.pipeline_mode<synchronous>, transform_indices = @transform_10, window_bounds = array<i64: 32, 32>}, {pipeline_mode = #tpu.pipeline_mode<synchronous>, transform_indices = @transform_11, window_bounds = array<i64: 1, 32>}, {transform_indices = @transform_12, window_bounds = array<i64: 8, 128>}]} {
    %c0 = arith.constant 0 : index
    %c0_0 = arith.constant 0 : index
    %0 = vector.load %arg1[%c0, %c0_0] : memref<8x16xf32, #tpu.memory_space<vmem>>, vector<8x16xf32>
    %c0_1 = arith.constant 0 : index
    %c0_2 = arith.constant 0 : index
    %1 = vector.load %arg2[%c0_1, %c0_2] : memref<8x16xf32, #tpu.memory_space<vmem>>, vector<8x16xf32>
    %c0_3 = arith.constant 0 : index
    %c0_4 = arith.constant 0 : index
    %2 = vector.load %arg4[%c0_3, %c0_4] : memref<1x16xf32, #tpu.memory_space<vmem>>, vector<1x16xf32>
    %cst = arith.constant 9.99999993E-9 : f32
    %3 = vector.broadcast %cst : f32 to vector<1x16xf32>
    %4 = arith.addf %2, %3 : vector<1x16xf32>
    %5 = tpu.reciprocal %4 : vector<1x16xf32> -> vector<1x16xf32>
    %cst_5 = arith.constant 1.000000e+00 : f32
    %6 = vector.broadcast %cst_5 : f32 to vector<1x16xf32>
    %7 = arith.mulf %6, %5 : vector<1x16xf32>
    %8 = vector.broadcast %7 : vector<1x16xf32> to vector<8x16xf32>
    %9 = arith.mulf %8, %0 : vector<8x16xf32>
    %cst_6 = arith.constant 5.000000e-01 : f32
    %10 = vector.broadcast %cst_6 : f32 to vector<8x16xf32>
    %11 = arith.mulf %10, %1 : vector<8x16xf32>
    %12 = math.exp %11 : vector<8x16xf32>
    %c0_7 = arith.constant 0 : index
    %c0_8 = arith.constant 0 : index
    %13 = vector.load %arg3[%c0_7, %c0_8] : memref<8x16xf32, #tpu.memory_space<vmem>>, vector<8x16xf32>
    %14 = arith.mulf %13, %12 : vector<8x16xf32>
    %15 = arith.addf %9, %14 : vector<8x16xf32>
    %16 = arith.truncf %15 : vector<8x16xf32> to vector<8x16xbf16>
    %c0_9 = arith.constant 0 : index
    %c0_10 = arith.constant 0 : index
    %17 = vector.load %arg5[%c0_9, %c0_10] : memref<16x32xbf16, #tpu.memory_space<vmem>>, vector<16x32xbf16>
    %cst_11 = arith.constant dense<0.000000e+00> : vector<8x32xf32>
    %18 = tpu.matmul %16, %17, %cst_11 {dimension_numbers = #tpu.dot_dimension_numbers<[1], [0], [0], [1], [0, 0, 1, 1], [], []>} : vector<8x16xbf16>, vector<16x32xbf16>, vector<8x32xf32> -> vector<8x32xf32>
    %c0_12 = arith.constant 0 : index
    %c0_13 = arith.constant 0 : index
    %19 = vector.load %arg6[%c0_12, %c0_13] : memref<1x32xf32, #tpu.memory_space<vmem>>, vector<1x32xf32>
    %20 = vector.broadcast %19 : vector<1x32xf32> to vector<8x32xf32>
    %21 = arith.addf %18, %20 : vector<8x32xf32>
    %cst_14 = arith.constant 0.000000e+00 : f32
    %22 = vector.broadcast %cst_14 : f32 to vector<8x32xf32>
    %23 = arith.maximumf %21, %22 : vector<8x32xf32>
    %24 = arith.truncf %23 : vector<8x32xf32> to vector<8x32xbf16>
    %c0_15 = arith.constant 0 : index
    %c0_16 = arith.constant 0 : index
    %25 = vector.load %arg7[%c0_15, %c0_16] : memref<32x64xbf16, #tpu.memory_space<vmem>>, vector<32x64xbf16>
    %cst_17 = arith.constant dense<0.000000e+00> : vector<8x64xf32>
    %26 = tpu.matmul %24, %25, %cst_17 {dimension_numbers = #tpu.dot_dimension_numbers<[1], [0], [0], [1], [0, 0, 1, 1], [], []>} : vector<8x32xbf16>, vector<32x64xbf16>, vector<8x64xf32> -> vector<8x64xf32>
    %c0_18 = arith.constant 0 : index
    %c0_19 = arith.constant 0 : index
    %27 = vector.load %arg8[%c0_18, %c0_19] : memref<1x64xf32, #tpu.memory_space<vmem>>, vector<1x64xf32>
    %28 = vector.broadcast %27 : vector<1x64xf32> to vector<8x64xf32>
    %29 = arith.addf %26, %28 : vector<8x64xf32>
    %30 = arith.negf %29 : vector<8x64xf32>
    %31 = math.exp %30 : vector<8x64xf32>
    %cst_20 = arith.constant 1.000000e+00 : f32
    %32 = vector.broadcast %cst_20 : f32 to vector<8x64xf32>
    %33 = arith.addf %32, %31 : vector<8x64xf32>
    %34 = arith.divf %32, %33 : vector<8x64xf32>
    %35 = arith.truncf %34 : vector<8x64xf32> to vector<8x64xbf16>
    %c0_21 = arith.constant 0 : index
    %c0_22 = arith.constant 0 : index
    %36 = vector.load %arg9[%c0_21, %c0_22] : memref<64x32xbf16, #tpu.memory_space<vmem>>, vector<64x32xbf16>
    %cst_23 = arith.constant dense<0.000000e+00> : vector<8x32xf32>
    %37 = tpu.matmul %35, %36, %cst_23 {dimension_numbers = #tpu.dot_dimension_numbers<[1], [0], [0], [1], [0, 0, 1, 1], [], []>} : vector<8x64xbf16>, vector<64x32xbf16>, vector<8x32xf32> -> vector<8x32xf32>
    %c0_24 = arith.constant 0 : index
    %c0_25 = arith.constant 0 : index
    %38 = vector.load %arg10[%c0_24, %c0_25] : memref<1x32xf32, #tpu.memory_space<vmem>>, vector<1x32xf32>
    %39 = vector.broadcast %38 : vector<1x32xf32> to vector<8x32xf32>
    %40 = arith.addf %37, %39 : vector<8x32xf32>
    %cst_26 = arith.constant 0.000000e+00 : f32
    %41 = vector.broadcast %cst_26 : f32 to vector<8x32xf32>
    %42 = arith.maximumf %40, %41 : vector<8x32xf32>
    %43 = arith.truncf %42 : vector<8x32xf32> to vector<8x32xbf16>
    %c0_27 = arith.constant 0 : index
    %c0_28 = arith.constant 0 : index
    %44 = vector.load %arg11[%c0_27, %c0_28] : memref<32x32xbf16, #tpu.memory_space<vmem>>, vector<32x32xbf16>
    %cst_29 = arith.constant dense<0.000000e+00> : vector<8x32xf32>
    %45 = tpu.matmul %43, %44, %cst_29 {dimension_numbers = #tpu.dot_dimension_numbers<[1], [0], [0], [1], [0, 0, 1, 1], [], []>} : vector<8x32xbf16>, vector<32x32xbf16>, vector<8x32xf32> -> vector<8x32xf32>
    %c0_30 = arith.constant 0 : index
    %c0_31 = arith.constant 0 : index
    %46 = vector.load %arg12[%c0_30, %c0_31] : memref<1x32xf32, #tpu.memory_space<vmem>>, vector<1x32xf32>
    %47 = vector.broadcast %46 : vector<1x32xf32> to vector<8x32xf32>
    %48 = arith.addf %45, %47 : vector<8x32xf32>
    %49 = tpu.concatenate %34, %9, %15, %48 in 1 : vector<8x64xf32>, vector<8x16xf32>, vector<8x16xf32>, vector<8x32xf32> -> vector<8x128xf32>
    %c0_32 = arith.constant 0 : index
    %c0_33 = arith.constant 0 : index
    %50 = vector.load %arg13[%c0_32, %c0_33] : memref<8x128xf32, #tpu.memory_space<vmem>>, vector<8x128xf32>
    tpu.vector_store %arg13[%c0_32, %c0_33], %49 {strides = array<i32>} : memref<8x128xf32, #tpu.memory_space<vmem>>, vector<8x128xf32>,
    return
  }
  func.func @transform_0(%arg0: i32) -> (i32, i32) {
    %c0_i32 = arith.constant 0 : i32
    %c0_i32_0 = arith.constant 0 : i32
    return %arg0, %c0_i32 : i32, i32
  }
  func.func @transform_1(%arg0: i32) -> (i32, i32) {
    %c0_i32 = arith.constant 0 : i32
    %c0_i32_0 = arith.constant 0 : i32
    return %arg0, %c0_i32 : i32, i32
  }
  func.func @transform_2(%arg0: i32) -> (i32, i32) {
    %c0_i32 = arith.constant 0 : i32
    %c0_i32_0 = arith.constant 0 : i32
    return %arg0, %c0_i32 : i32, i32
  }
  func.func @transform_3(%arg0: i32) -> (i32, i32) {
    %c0_i32 = arith.constant 0 : i32
    %c0_i32_0 = arith.constant 0 : i32
    %c0_i32_1 = arith.constant 0 : i32
    return %c0_i32, %c0_i32_0 : i32, i32
  }
  func.func @transform_4(%arg0: i32) -> (i32, i32) {
    %c0_i32 = arith.constant 0 : i32
    %c0_i32_0 = arith.constant 0 : i32
    %c0_i32_1 = arith.constant 0 : i32
    return %c0_i32, %c0_i32_0 : i32, i32
  }
  func.func @transform_5(%arg0: i32) -> (i32, i32) {
    %c0_i32 = arith.constant 0 : i32
    %c0_i32_0 = arith.constant 0 : i32
    %c0_i32_1 = arith.constant 0 : i32
    return %c0_i32, %c0_i32_0 : i32, i32
  }
  func.func @transform_6(%arg0: i32) -> (i32, i32) {
    %c0_i32 = arith.constant 0 : i32
    %c0_i32_0 = arith.constant 0 : i32
    %c0_i32_1 = arith.constant 0 : i32
    return %c0_i32, %c0_i32_0 : i32, i32
  }
  func.func @transform_7(%arg0: i32) -> (i32, i32) {
    %c0_i32 = arith.constant 0 : i32
    %c0_i32_0 = arith.constant 0 : i32
    %c0_i32_1 = arith.constant 0 : i32
    return %c0_i32, %c0_i32_0 : i32, i32
  }
  func.func @transform_8(%arg0: i32) -> (i32, i32) {
    %c0_i32 = arith.constant 0 : i32
    %c0_i32_0 = arith.constant 0 : i32
    %c0_i32_1 = arith.constant 0 : i32
    return %c0_i32, %c0_i32_0 : i32, i32
  }
  func.func @transform_9(%arg0: i32) -> (i32, i32) {
    %c0_i32 = arith.constant 0 : i32
    %c0_i32_0 = arith.constant 0 : i32
    %c0_i32_1 = arith.constant 0 : i32
    return %c0_i32, %c0_i32_0 : i32, i32
  }
  func.func @transform_10(%arg0: i32) -> (i32, i32) {
    %c0_i32 = arith.constant 0 : i32
    %c0_i32_0 = arith.constant 0 : i32
    %c0_i32_1 = arith.constant 0 : i32
    return %c0_i32, %c0_i32_0 : i32, i32
  }
  func.func @transform_11(%arg0: i32) -> (i32, i32) {
    %c0_i32 = arith.constant 0 : i32
    %c0_i32_0 = arith.constant 0 : i32
    %c0_i32_1 = arith.constant 0 : i32
    return %c0_i32, %c0_i32_0 : i32, i32
  }
  func.func @transform_12(%arg0: i32) -> (i32, i32) {
    %c0_i32 = arith.constant 0 : i32
    %c0_i32_0 = arith.constant 0 : i32
    return %arg0, %c0_i32 : i32, i32
  }
}

</mosaic_0001>

<bundles_post_ra>
// kernel: scale_vae_forward.2
= control target key start
LH: loop header
LB: loop body
LE: loop exit
PB: predicated region body
PF: predicated region fallthrough
CT: control target
= control target key end

     0   :  { %v316_v0 = vmov 0.0   ;;  %vm317_vm0 = vmmov 0   ;;  %vm67_vm1 = vcmask 523264   ;;  %vm136_vm2 = vcmask 261120   ;;  %s403_s1 = inlined_call_operand.vmem [shape: bf16[64,32], index: 1, kind: input, shape index: {}]   ;;  %s404_s0 = inlined_call_operand.vmem [shape: bf16[8,64], index: 0, kind: input, shape index: {}]   ;;  %s405_s3 = inlined_call_operand.vmem [shape: bf16[32,32], index: 3, kind: input, shape index: {}]   ;;  %s406_s5 = inlined_call_operand.vmem [shape: bf16[32,32], index: 5, kind: input, shape index: {}]   ;;  %s407_s2 = inlined_call_operand.vmem [shape: f32[1,32], index: 2, kind: input, shape index: {}]   ;;  %s408_s4 = inlined_call_operand.vmem [shape: f32[1,32], index: 4, kind: input, shape index: {}]   ;;  %s409_s6 = inlined_call_operand.vmem [shape: f32[1,32], index: 6, kind: input, shape index: {}]   ;;  %s410_s7 = inlined_call_operand.vmem [shape: f32[8,32], index: 7, kind: output, shape index: {}]  }
   0x1   :  { %278 = vmatprep.subr.bf16.mxu0 %v316_v0  ;;  %v308_v1 = vld [vmem:[%s403_s1] sm:$0xff]   ;;  %286 = vmatprep.mubr.msk.bf16.mxu0 %vm317_vm0, %v316_v0  ;;  %v309_v2 = vld [vmem:[%s403_s1 + $0x8] sm:$0xff]   ;;  %v310_v3 = vld [vmem:[%s403_s1 + $0x10] sm:$0xff]  }
   0x2   :  { %290 = vmatprep.subr.bf16.mxu1 %v316_v0  ;;  %294 = vmatprep.mubr.msk.bf16.mxu1 %vm317_vm0, %v316_v0  ;;  %v311_v4 = vld [vmem:[%s403_s1 + $0x18] sm:$0xff]   ;;  %v27_v5 = vld [vmem:[%s404_s0] sm:$0xf]  ;;  %v313_v7 = vld [vmem:[%s405_s3 + $0x8] sm:$0xff]  }
   0x3   :  { %279 = vmatpush3.bf16.msra.mxu0 %v308_v1  ;;  %v312_v6 = vld [vmem:[%s405_s3] sm:$0xff]   ;;  %v315_v17 = vld [vmem:[%s406_s5 + $0x8] sm:$0xff]  }
   0x4   :  { %280 = vmatprep.subr.bf16.mxu0 %v316_v0  ;;  %291 = vmatpush3.bf16.msra.mxu1 %v312_v6  ;;  %v253_v8 = vld [vmem:[%s407_s2] ss:$0 sm:$0xff] }
   0x5   :  { %292 = vmatprep.subr.bf16.mxu1 %v316_v0  ;;  %v314_v15 = vld [vmem:[%s406_s5] sm:$0xff]  }
   0x6   :  { %v259_v18 = vld [vmem:[%s408_s4] ss:$0 sm:$0xff] }
   0x7   :  { %281 = vmatpush3.bf16.msra.mxu0 %v309_v2  ;;  %v263_v26 = vld [vmem:[%s409_s6] ss:$0 sm:$0xff] }
   0x8   :  { %282 = vmatprep.subr.bf16.mxu0 %v316_v0  ;;  %293 = vmatpush3.bf16.msra.mxu1 %v313_v7 }
   0x9   :  { %298 = vmatprep.subr.bf16.mxu1 %v316_v0 }
   0xb   :  { %283 = vmatpush3.bf16.msra.mxu0 %v310_v3 }
   0xc   :  { %284 = vmatprep.subr.bf16.mxu0 %v316_v0 }
   0xf   :  { %285 = vmatpush3.bf16.msra.mxu0 %v311_v4 }
  0x12   :  { %287 = vmatmul.mubr.msk.bf16.vlgmr.msra.gmra.mrb[0].mxu0 %vm67_vm1, %v27_v5 }
  0xe5   :  { %v105_v9 = vpop.f32.mrb[0].mxu0 }
  0xe6   :  { %v106_v10 = vadd.f32 %v253_v8, %v105_v9  ;;  %v288_v11 = vpop.f32.mrb[1].mxu0 }
  0xe7   :  { %v108_v12 = vpop.f32.mrb[2].mxu0 }
  0xe8   :  { %v111_v13 = vmax.f32 %v106_v10, 0.0  ;;  %v289_v14 = vpop.f32.mrb[3].mxu0 }
  0xea   :  { %v112_v16 = vpack.c.bf16 %v111_v13, %v111_v13 }
  0xec   :  { %295 = vmatmul.mubr.msk.bf16.vlgmr.msra.gmra.mrb[0].mxu1 %vm136_vm2, %v112_v16 }
  0xed   :  { %299 = vmatpush3.bf16.msra.mxu1 %v314_v15  ;;  %302 = vmatprep.mubr.msk.bf16.mxu1 %vm317_vm0, %v316_v0 }
  0xee   :  { %300 = vmatprep.subr.bf16.mxu1 %v316_v0 }
  0xf1   :  { %301 = vmatpush3.bf16.msra.mxu1 %v315_v17 }
 0x1bf   :  { %v174_v19 = vpop.f32.mrb[0].mxu1 }
 0x1c0   :  { %v175_v20 = vadd.f32 %v259_v18, %v174_v19  ;;  %v296_v21 = vpop.f32.mrb[1].mxu1 }
 0x1c1   :  { %v177_v22 = vpop.f32.mrb[2].mxu1 }
 0x1c2   :  { %v180_v23 = vmax.f32 %v175_v20, 0.0  ;;  %v297_v24 = vpop.f32.mrb[3].mxu1 }
 0x1c4   :  { %v181_v25 = vpack.c.bf16 %v180_v23, %v180_v23 }
 0x1c6   :  { %303 = vmatmul.mubr.msk.bf16.vlgmr.msra.gmra.mrb[4].mxu1 %vm136_vm2, %v181_v25 }
 0x299   :  { %v242_v27 = vpop.f32.mrb[4].mxu1 }
 0x29a   :  { %v243_v28 = vadd.f32 %v263_v26, %v242_v27  ;;  %v304_v29 = vpop.f32.mrb[5].mxu1 }
 0x29b   :  { %v245_v30 = vpop.f32.mrb[6].mxu1 }
 0x29c   :  { %248 = vst.msk [vmem:[%s410_s7] sm:$0xff] %vm136_vm2, %v243_v28  ;;  %v305_v31 = vpop.f32.mrb[7].mxu1 }

// kernel: scale_vae_forward.3
= control target key start
LH: loop header
LB: loop body
LE: loop exit
PB: predicated region body
PF: predicated region fallthrough
CT: control target
= control target key end

     0   :  { %v456_v0 = vmov 0.0   ;;  %vm457_vm0 = vmmov 0   ;;  %v48_v6 = vlaneseq  ;;  %vm76_vm1 = vcmask 130048   ;;  %s458_s30 = smov 64   ;;  %s459_s13 = smov 80   ;;  %s599_s4 = inlined_call_operand.vmem [shape: bf16[16,32], index: 4, kind: input, shape index: {}]   ;;  %s600_s1 = inlined_call_operand.vmem [shape: f32[8,16], index: 1, kind: input, shape index: {}]   ;;  %s601_s3 = inlined_call_operand.vmem [shape: f32[1,16], index: 3, kind: input, shape index: {}]   ;;  %s602_s0 = inlined_call_operand.vmem [shape: f32[8,16], index: 0, kind: input, shape index: {}]   ;;  %s603_s2 = inlined_call_operand.vmem [shape: f32[8,16], index: 2, kind: input, shape index: {}]   ;;  %s604_s6 = inlined_call_operand.vmem [shape: bf16[32,64], index: 6, kind: input, shape index: {}]   ;;  %s605_s5 = inlined_call_operand.vmem [shape: f32[1,32], index: 5, kind: input, shape index: {}]   ;;  %s606_s8 = inlined_call_operand.vmem [shape: bf16[64,32], index: 8, kind: input, shape index: {}]   ;;  %s607_s10 = inlined_call_operand.vmem [shape: bf16[32,32], index: 10, kind: input, shape index: {}]   ;;  %s608_s7 = inlined_call_operand.vmem [shape: f32[1,64], index: 7, kind: input, shape index: {}]   ;;  %s609_s9 = inlined_call_operand.vmem [shape: f32[1,32], index: 9, kind: input, shape index: {}]   ;;  %s610_s11 = inlined_call_operand.vmem [shape: f32[1,32], index: 11, kind: input, shape index: {}]   ;;  %s611_s12 = inlined_call_operand.vmem [shape: f32[8,128], index: 12, kind: output, shape index: {}]  }
   0x1   :  { %400 = vmatprep.subr.bf16.mxu0 %v456_v0  ;;  %v439_v1 = vld [vmem:[%s599_s4] sm:$0xff]   ;;  %402 = vmatprep.mubr.msk.bf16.mxu0 %vm457_vm0, %v456_v0  ;;  %v441_v20 = vld [vmem:[%s604_s6 + $0x8] sm:$0xff]   ;;  %vm145_vm2 = vcmask 261120   ;;  %v444_v31 = vld [vmem:[%s606_s8 + $0x10] sm:$0xff]   ;;  %vm235_vm3 = vcmask 523264   ;;  %vm360_vm4 = vcmask 654336  }
   0x2   :  { %v43_v2 = vld [vmem:[%s600_s1] sm:$0xff]  ;;  %406 = vmatprep.subr.bf16.mxu1 %v456_v0  ;;  %410 = vmatprep.mubr.msk.bf16.mxu1 %vm457_vm0, %v456_v0  ;;  %v49_v8 = vshrl.u32 %v48_v6, 7  ;;  %v443_v30 = vld [vmem:[%s606_s8 + $0x8] sm:$0xff]   ;;  %v445_v32 = vld [vmem:[%s606_s8 + $0x18] sm:$0xff]   ;;  %vm362_vm5 = vcmask 785408  }
   0x3   :  { %v44_v3 = vld [vmem:[%s601_s3] sm:$0x1]  ;;  %401 = vmatpush3.bf16.msra.mxu0 %v439_v1  ;;  %v54_v5 = vmul.f32 0.5, %v43_v2  ;;  %v447_v47 = vld [vmem:[%s607_s10 + $0x8] sm:$0xff]  }
   0x4   :  { %v45_v4 = vadd.f32 1e-08, %v44_v3  ;;  %414 = vmatprep.subr.bf16.mxu0 %v456_v0  ;;  %v50_v9 = vsub.s32 0, %v49_v8  ;;  %v42_v11 = vld [vmem:[%s602_s0] sm:$0xff] }
   0x5   :  { %v55_v7 = vmul.f32 1.442695, %v54_v5  ;;  %v57_v12 = vld [vmem:[%s603_s2] sm:$0xff] }
   0x6   :  { %448 = vrcp.f32 %v45_v4  ;;  %v440_v19 = vld [vmem:[%s604_s6] sm:$0xff]  }
   0x7   :  { %450 = vpow2.f32 %v55_v7  ;;  %407 = vmatpush3.bf16.msra.mxu1 %v440_v19  ;;  %v369_v21 = vld [vmem:[%s605_s5] ss:$0 sm:$0xff] }
   0x8   :  { %408 = vmatprep.subr.bf16.mxu1 %v456_v0  ;;  %v442_v29 = vld [vmem:[%s606_s8] sm:$0xff]  }
   0x9   :  { %v446_v33 = vld [vmem:[%s607_s10] sm:$0xff]   ;;  %s460_s10 = smov 96  }
   0xa   :  { %v372_v34 = vld [vmem:[%s608_s7] ss:$0 sm:$0xff] }
   0xb   :  { %409 = vmatpush3.bf16.msra.mxu1 %v441_v20  ;;  %v377_v48 = vld [vmem:[%s609_s9] ss:$0 sm:$0xff] }
   0xc   :  { %426 = vmatprep.subr.bf16.mxu1 %v456_v0  ;;  %v383_v56 = vld [vmem:[%s610_s11] ss:$0 sm:$0xff] }
  0x10   :  { %v449_v10 = vpop.eup %448 }
  0x11   :  { %v51_v13 = vrot.slane %v449_v10, %v50_v9  ;;  %v451_v14 = vpop.eup %450 }
  0x12   :  { %v58_v16 = vmul.f32 %v451_v14, %v57_v12 }
  0x13   :  { %v53_v15 = vmul.f32 %v51_v13, %v42_v11 }
  0x15   :  { %v59_v17 = vadd.f32 %v58_v16, %v53_v15  ;;  %348 = vrot.lane.b32.xlu0 %v53_v15, %s458_s30 }
  0x17   :  { %v60_v18 = vpack.c.bf16 %v59_v17, %v59_v17 }
  0x19   :  { %403 = vmatmul.mubr.msk.bf16.vlgmr.msra.gmra.mrb[0].mxu0 %vm76_vm1, %v60_v18  ;;  %352 = vrot.lane.b32.xlu0 %v59_v17, %s459_s13 }
  0x1a   :  { %422 = vmatprep.mubr.msk.bf16.mxu0 %vm457_vm0, %v456_v0  ;;  %415 = vmatpush3.bf16.msra.mxu0 %v442_v29 }
  0x1b   :  { %416 = vmatprep.subr.bf16.mxu0 %v456_v0 }
  0x1e   :  { %417 = vmatpush3.bf16.msra.mxu0 %v443_v30 }
  0x1f   :  { %418 = vmatprep.subr.bf16.mxu0 %v456_v0 }
  0x22   :  { %419 = vmatpush3.bf16.msra.mxu0 %v444_v31 }
  0x23   :  { %420 = vmatprep.subr.bf16.mxu0 %v456_v0 }
  0x26   :  { %421 = vmatpush3.bf16.msra.mxu0 %v445_v32 }
  0x87   :  { %v349_v44 = vpop.permute.xlu0 %348 }
  0x8b   :  { %v353_v62 = vpop.permute.xlu0 %352 }
  0xec   :  { %v114_v22 = vpop.f32.mrb[0].mxu0 }
  0xed   :  { %v115_v23 = vadd.f32 %v369_v21, %v114_v22  ;;  %v404_v24 = vpop.f32.mrb[1].mxu0 }
  0xee   :  { %v117_v25 = vpop.f32.mrb[2].mxu0 }
  0xef   :  { %v120_v26 = vmax.f32 %v115_v23, 0.0  ;;  %v405_v27 = vpop.f32.mrb[3].mxu0 }
  0xf1   :  { %v121_v28 = vpack.c.bf16 %v120_v26, %v120_v26 }
  0xf3   :  { %411 = vmatmul.mubr.msk.bf16.vlgmr.msra.gmra.mrb[0].mxu1 %vm145_vm2, %v121_v28 }
  0xf4   :  { %430 = vmatprep.mubr.msk.bf16.mxu1 %vm457_vm0, %v456_v0  ;;  %427 = vmatpush3.bf16.msra.mxu1 %v446_v33 }
  0xf5   :  { %428 = vmatprep.subr.bf16.mxu1 %v456_v0 }
  0xf8   :  { %429 = vmatpush3.bf16.msra.mxu1 %v447_v47 }
 0x1c6   :  { %v183_v35 = vpop.f32.mrb[0].mxu1 }
 0x1c7   :  { %v184_v36 = vadd.f32 %v372_v34, %v183_v35  ;;  %v412_v37 = vpop.f32.mrb[1].mxu1 }
 0x1c8   :  { %v186_v38 = vpop.f32.mrb[2].mxu1 }
 0x1c9   :  { %v376_v39 = vmul.f32 -1.442695, %v184_v36  ;;  %v413_v40 = vpop.f32.mrb[3].mxu1 }
 0x1cb   :  { %452 = vpow2.f32 %v376_v39 }
 0x1d5   :  { %v453_v41 = vpop.eup %452 }
 0x1d6   :  { %v192_v42 = vadd.f32 1.0, %v453_v41 }
 0x1d8   :  { %454 = vrcp.f32 %v192_v42 }
 0x1e2   :  { %v455_v43 = vpop.eup %454 }
 0x1e3   :  { %v359_v45 = vsel %vm235_vm3, %v455_v43, %v349_v44  ;;  %v195_v46 = vpack.c.bf16 %v455_v43, %v455_v43 }
 0x1e4   :  { %v361_v63 = vsel %vm360_vm4, %v359_v45, %v353_v62 }
 0x1e5   :  { %423 = vmatmul.mubr.msk.bf16.vlgmr.msra.gmra.mrb[4].mxu0 %vm235_vm3, %v195_v46 }
 0x2b8   :  { %v273_v49 = vpop.f32.mrb[4].mxu0 }
 0x2b9   :  { %v274_v50 = vadd.f32 %v377_v48, %v273_v49  ;;  %v424_v51 = vpop.f32.mrb[5].mxu0 }
 0x2ba   :  { %v276_v52 = vpop.f32.mrb[6].mxu0 }
 0x2bb   :  { %v279_v53 = vmax.f32 %v274_v50, 0.0  ;;  %v425_v54 = vpop.f32.mrb[7].mxu0 }
 0x2bd   :  { %v280_v55 = vpack.c.bf16 %v279_v53, %v279_v53 }
 0x2bf   :  { %431 = vmatmul.mubr.msk.bf16.vlgmr.msra.gmra.mrb[4].mxu1 %vm145_vm2, %v280_v55 }
 0x392   :  { %v341_v57 = vpop.f32.mrb[4].mxu1 }
 0x393   :  { %v342_v58 = vadd.f32 %v383_v56, %v341_v57  ;;  %v432_v59 = vpop.f32.mrb[5].mxu1 }
 0x394   :  { %v344_v60 = vpop.f32.mrb[6].mxu1 }
 0x395   :  { %356 = vrot.lane.b32.xlu1 %v342_v58, %s460_s10  ;;  %v433_v61 = vpop.f32.mrb[7].mxu1 }
 0x407   :  { %v357_v0 = vpop.permute.xlu1 %356 }
 0x408   :  { %v363_v1 = vsel %vm362_vm5, %v361_v63, %v357_v0 }
 0x409   :  { %364 = vst [vmem:[%s611_s12] sm:$0xff] %v363_v1 }

</bundles_post_ra>
